<compile_context>
chip_gen: v7x
topology: tpu7x:2x2x1
jax: 0.10.0
libtpu: 0.0.40
codegen_flags: <defaults>
</compile_context>

<pallas_src>
import functools
import math

import jax
import jax.numpy as jnp
from jax.experimental import pallas as pl
from jax.experimental.pallas import tpu as pltpu

LOG_SIG_MAX = 2.0
LOG_SIG_MIN = -20.0
TANH_EPS = 1e-6                      # rlkit TanhNormal epsilon
HALF_LOG_2PI = 0.5 * math.log(2.0 * math.pi)


def _cdiv(a, b):
    return -(-a // b)


def _round_up(x, m):
    return ((x + m - 1) // m) * m


def _policy_kernel(obs_ref, eps_ref,
                   w0_ref, b0_ref, w1_ref, b1_ref,
                   wms_ref, bms_ref,
                   out_ref, *, action_dim, out_width):
    A = action_dim

    # --- fcs TargetNetwork: hidden layer (ReLU) + output layer (ReLU out_fn) ---
    # bf16 operands on the MXU, f32 accumulation, f32 bias/ReLU.
    x = obs_ref[...].astype(jnp.bfloat16)
    h = jnp.dot(x, w0_ref[...], preferred_element_type=jnp.float32) + b0_ref[...]
    h = jnp.maximum(h, 0.0).astype(jnp.bfloat16)
    h = jnp.dot(h, w1_ref[...], preferred_element_type=jnp.float32) + b1_ref[...]
    h = jnp.maximum(h, 0.0).astype(jnp.bfloat16)

    # --- fused, lane-dense heads: one dot gives [mean | log_std_raw | 0...] ---
    y = jnp.dot(h, wms_ref[...], preferred_element_type=jnp.float32) + bms_ref[...]
    mean = y[:, :A]
    log_std = jnp.clip(y[:, A:2 * A], LOG_SIG_MIN, LOG_SIG_MAX)
    std = jnp.exp(log_std)

    # --- TanhNormal rsample + log_prob (f32 epilogue) ---
    eps = eps_ref[...]
    pre_tanh = mean + std * eps
    action = jnp.tanh(pre_tanh)

    # Normal(mean, std).log_prob(pre_tanh): since pre_tanh = mean + std*eps,
    # ((pre_tanh - mean)/std)^2 == eps^2 exactly -> skip the subtract/divide.
    normal_lp = -0.5 * jnp.square(eps) - log_std - HALF_LOG_2PI
    # TanhNormal correction (rlkit formulation): - log(1 - tanh(z)^2 + eps)
    lp = normal_lp - jnp.log(1.0 - jnp.square(action) + TANH_EPS)
    log_prob = jnp.sum(lp, axis=1, keepdims=True)

    # --- pack into one lane-dense (TB, out_width) tile via direct sliced stores;
    #     single unmasked writeback DMA per grid step, no concat shuffles. ---
    tb = action.shape[0]
    out_ref[...] = jnp.zeros((tb, out_width), jnp.float32)   # pad lanes (never read)
    out_ref[:, 0 * A:1 * A] = action
    out_ref[:, 1 * A:2 * A] = mean
    out_ref[:, 2 * A:3 * A] = log_std
    out_ref[:, 3 * A:4 * A] = std
    out_ref[:, 4 * A:5 * A] = pre_tanh
    out_ref[:, 5 * A:5 * A + 1] = log_prob


def _choose_tile(B, batch_tile):
    # >= 2 grid steps whenever B allows it, so v7x megacore gets both TCs busy;
    # balance the tiles so the wrapper pad copy stays minimal.
    min_tiles = 2 if B >= 16 else 1
    n_tiles = max(_cdiv(B, batch_tile), min_tiles)
    TB = _round_up(_cdiv(B, n_tiles), 8)
    Bp = TB * _cdiv(B, TB)
    return TB, Bp


def tanh_gaussian_hnet_policy(obs, eps, params, *, batch_tile=1024):
    """params = dict(w0,b0,w1,b1,wm,bm,ws,bs). Biases are [1, out].

    Returns (action, mean, log_std, log_prob, std, pre_tanh), all f32.
    """
    B, obs_dim = obs.shape
    A = params["wm"].shape[1]
    h0 = params["w0"].shape[1]
    h1 = params["w1"].shape[1]

    HEAD_W = _round_up(2 * A, 128)      # lane-dense fused head width
    OUT_W = _round_up(5 * A + 1, 128)   # lane-dense output slab width

    # Fused + zero-padded head weights (lane-dense head matmul); bf16 weights.
    # In real use these are precomputed once per weight-set; tiny here.
    wms = jnp.zeros((h1, HEAD_W), jnp.float32)
    wms = wms.at[:, :A].set(params["wm"]).at[:, A:2 * A].set(params["ws"])
    wms = wms.astype(jnp.bfloat16)
    bms = jnp.zeros((1, HEAD_W), jnp.float32)
    bms = bms.at[:, :A].set(params["bm"]).at[:, A:2 * A].set(params["bs"])

    w0 = params["w0"].astype(jnp.bfloat16)
    w1 = params["w1"].astype(jnp.bfloat16)
    b0 = params["b0"].astype(jnp.float32)
    b1 = params["b1"].astype(jnp.float32)

    TB, Bp = _choose_tile(B, batch_tile)
    if Bp != B:
        pad = Bp - B
        obs = jnp.pad(obs, ((0, pad), (0, 0)))
        eps = jnp.pad(eps, ((0, pad), (0, 0)))

    # Explicit scoped-VMEM budget (double-buffered streams + resident weights +
    # headroom). Floor at the 32 MiB scoped default, cap well under v7x's 64 MiB.
    stream_bytes = 2 * 4 * TB * (obs_dim + A + OUT_W)
    weight_bytes = 2 * (2 * (obs_dim * h0 + h0 * h1 + h1 * HEAD_W)
                        + 4 * (h0 + h1 + HEAD_W))
    scratch_bytes = 2 * 4 * TB * (h0 + h1 + HEAD_W)
    vmem_limit = int(min(max(stream_bytes + weight_bytes + scratch_bytes + (4 << 20),
                             32 << 20), 48 << 20))

    kernel = functools.partial(_policy_kernel, action_dim=A, out_width=OUT_W)

    slab = pl.pallas_call(
        kernel,
        out_shape=jax.ShapeDtypeStruct((Bp, OUT_W), jnp.float32),
        grid=(Bp // TB,),
        in_specs=[
            pl.BlockSpec((TB, obs_dim),   lambda i: (i, 0)),   # obs  (streamed)
            pl.BlockSpec((TB, A),         lambda i: (i, 0)),   # eps  (streamed)
            pl.BlockSpec((obs_dim, h0),   lambda i: (0, 0)),   # w0   (resident, bf16)
            pl.BlockSpec((1, h0),         lambda i: (0, 0)),   # b0
            pl.BlockSpec((h0, h1),        lambda i: (0, 0)),   # w1   (resident, bf16)
            pl.BlockSpec((1, h1),         lambda i: (0, 0)),   # b1
            pl.BlockSpec((h1, HEAD_W),    lambda i: (0, 0)),   # [wm|ws|0] fused (bf16)
            pl.BlockSpec((1, HEAD_W),     lambda i: (0, 0)),   # [bm|bs|0] fused
        ],
        out_specs=pl.BlockSpec((TB, OUT_W), lambda i: (i, 0)),
        compiler_params=pltpu.CompilerParams(
            dimension_semantics=("parallel",),
            vmem_limit_bytes=vmem_limit),
    )(obs, eps, w0, b0, w1, b1, wms, bms)

    slab = slab[:B]
    action   = slab[:, 0 * A:1 * A]
    mean     = slab[:, 1 * A:2 * A]
    log_std  = slab[:, 2 * A:3 * A]
    std      = slab[:, 3 * A:4 * A]
    pre_tanh = slab[:, 4 * A:5 * A]
    log_prob = slab[:, 5 * A:5 * A + 1]
    return action, mean, log_std, log_prob, std, pre_tanh


def make_params(key, obs_dim, hidden_sizes, action_dim, init_w=0.001):
    """Deterministic synthetic weights matching the module's shapes.

    fcs: obs_dim -> hidden_sizes[0] (ReLU) -> hidden_sizes[-1] (ReLU out_fn)
    last_fc / last_fc_log_std: hidden -> action_dim (small init_w-scale init)
    """
    h0, h_last = hidden_sizes[0], hidden_sizes[-1]
    ks = jax.random.split(key, 8)
    return {
        "w0": jax.random.normal(ks[0], (obs_dim, h0), jnp.float32) / jnp.sqrt(obs_dim),
        "b0": jax.random.normal(ks[1], (1, h0), jnp.float32) * 0.01,
        "w1": jax.random.normal(ks[2], (h0, h_last), jnp.float32) / jnp.sqrt(h0),
        "b1": jax.random.normal(ks[3], (1, h_last), jnp.float32) * 0.01,
        "wm": jax.random.uniform(ks[4], (h_last, action_dim), jnp.float32, -init_w, init_w),
        "bm": jax.random.uniform(ks[5], (1, action_dim), jnp.float32, -init_w, init_w),
        "ws": jax.random.uniform(ks[6], (h_last, action_dim), jnp.float32, -init_w, init_w),
        "bs": jax.random.uniform(ks[7], (1, action_dim), jnp.float32, -init_w, init_w),
    }


def _reference(obs, eps, params):
    h = jnp.maximum(obs @ params["w0"] + params["b0"], 0.0)
    h = jnp.maximum(h @ params["w1"] + params["b1"], 0.0)
    mean = h @ params["wm"] + params["bm"]
    log_std = jnp.clip(h @ params["ws"] + params["bs"], LOG_SIG_MIN, LOG_SIG_MAX)
    std = jnp.exp(log_std)
    z = mean + std * eps
    a = jnp.tanh(z)
    lp = (-0.5 * ((z - mean) / std) ** 2 - log_std - HALF_LOG_2PI) \
         - jnp.log(1.0 - a ** 2 + TANH_EPS)
    lp = jnp.sum(lp, axis=1, keepdims=True)
    return a, mean, log_std, lp, std, z


def _check(outs, refs):
    action, mean, log_std, log_prob, std, pre_tanh = outs
    a_r, m_r, ls_r, lp_r, s_r, z_r = refs
    # bf16 matmuls -> loosened tolerances (epilogue is f32).
    assert jnp.allclose(action,   a_r,  atol=5e-3, rtol=2e-2)
    assert jnp.allclose(mean,     m_r,  atol=5e-3, rtol=2e-2)
    assert jnp.allclose(log_std,  ls_r, atol=5e-3, rtol=2e-2)
    assert jnp.allclose(std,      s_r,  atol=5e-3, rtol=2e-2)
    assert jnp.allclose(pre_tanh, z_r,  atol=5e-3, rtol=2e-2)
    assert jnp.allclose(log_prob, lp_r, atol=5e-2, rtol=2e-2)


if __name__ == "__main__":
    # Small, module-consistent shapes.
    OBS_DIM, ACTION_DIM = 32, 8
    HIDDEN_SIZES = (32, 32)

    key = jax.random.PRNGKey(0)
    k_obs, k_eps, k_par, k_obs2, k_eps2 = jax.random.split(key, 5)
    params = make_params(k_par, OBS_DIM, HIDDEN_SIZES, ACTION_DIM)

    # Case 1: B multiple of 8 (no pad).
    B = 8
    obs = jax.random.normal(k_obs, (B, OBS_DIM), jnp.float32)
    eps = jax.random.normal(k_eps, (B, ACTION_DIM), jnp.float32)
    outs = jax.block_until_ready(tanh_gaussian_hnet_policy(obs, eps, params))
    _check(outs, _reference(obs, eps, params))

    # Case 2: ragged B (exercises the minimal-pad tiling path).
    B2 = 12
    obs2 = jax.random.normal(k_obs2, (B2, OBS_DIM), jnp.float32)
    eps2 = jax.random.normal(k_eps2, (B2, ACTION_DIM), jnp.float32)
    outs2 = jax.block_until_ready(tanh_gaussian_hnet_policy(obs2, eps2, params))
    _check(outs2, _reference(obs2, eps2, params))

    print("KERNEL_OK")
</pallas_src>

<mosaic_0001>
module attributes {stable_mosaic.version = 11 : i64} {
  func.func @_policy_kernel(%arg0: i32, %arg1: memref<8x32xf32, #tpu.memory_space<vmem>>, %arg2: memref<8x8xf32, #tpu.memory_space<vmem>>, %arg3: memref<32x32xbf16, #tpu.memory_space<vmem>>, %arg4: memref<1x32xf32, #tpu.memory_space<vmem>>, %arg5: memref<32x32xbf16, #tpu.memory_space<vmem>>, %arg6: memref<1x32xf32, #tpu.memory_space<vmem>>, %arg7: memref<32x128xbf16, #tpu.memory_space<vmem>>, %arg8: memref<1x128xf32, #tpu.memory_space<vmem>>, %arg9: memref<8x128xf32, #tpu.memory_space<vmem>>) attributes {dimension_semantics = [#tpu.dimension_semantics<parallel>], iteration_bounds = array<i64: 1>, scalar_prefetch = 0 : i64, scratch_operands = 0 : i64, tpu.core_type = #tpu.core_type<tc>, window_params = [{transform_indices = @transform_0, window_bounds = array<i64: 8, 32>}, {transform_indices = @transform_1, window_bounds = array<i64: 8, 8>}, {pipeline_mode = #tpu.pipeline_mode<synchronous>, transform_indices = @transform_2, window_bounds = array<i64: 32, 32>}, {pipeline_mode = #tpu.pipeline_mode<synchronous>, transform_indices = @transform_3, window_bounds = array<i64: 1, 32>}, {pipeline_mode = #tpu.pipeline_mode<synchronous>, transform_indices = @transform_4, window_bounds = array<i64: 32, 32>}, {pipeline_mode = #tpu.pipeline_mode<synchronous>, transform_indices = @transform_5, window_bounds = array<i64: 1, 32>}, {pipeline_mode = #tpu.pipeline_mode<synchronous>, transform_indices = @transform_6, window_bounds = array<i64: 32, 128>}, {pipeline_mode = #tpu.pipeline_mode<synchronous>, transform_indices = @transform_7, window_bounds = array<i64: 1, 128>}, {transform_indices = @transform_8, window_bounds = array<i64: 8, 128>}]} {
    %c0 = arith.constant 0 : index
    %c0_0 = arith.constant 0 : index
    %0 = vector.load %arg1[%c0, %c0_0] : memref<8x32xf32, #tpu.memory_space<vmem>>, vector<8x32xf32>
    %1 = arith.truncf %0 : vector<8x32xf32> to vector<8x32xbf16>
    %c0_1 = arith.constant 0 : index
    %c0_2 = arith.constant 0 : index
    %2 = vector.load %arg3[%c0_1, %c0_2] : memref<32x32xbf16, #tpu.memory_space<vmem>>, vector<32x32xbf16>
    %cst = arith.constant dense<0.000000e+00> : vector<8x32xf32>
    %3 = tpu.matmul %1, %2, %cst {dimension_numbers = #tpu.dot_dimension_numbers<[1], [0], [0], [1], [0, 0, 1, 1], [], []>} : vector<8x32xbf16>, vector<32x32xbf16>, vector<8x32xf32> -> vector<8x32xf32>
    %c0_3 = arith.constant 0 : index
    %c0_4 = arith.constant 0 : index
    %4 = vector.load %arg4[%c0_3, %c0_4] : memref<1x32xf32, #tpu.memory_space<vmem>>, vector<1x32xf32>
    %5 = vector.broadcast %4 : vector<1x32xf32> to vector<8x32xf32>
    %6 = arith.addf %3, %5 : vector<8x32xf32>
    %cst_5 = arith.constant 0.000000e+00 : f32
    %7 = vector.broadcast %cst_5 : f32 to vector<8x32xf32>
    %8 = arith.maximumf %6, %7 : vector<8x32xf32>
    %9 = arith.truncf %8 : vector<8x32xf32> to vector<8x32xbf16>
    %c0_6 = arith.constant 0 : index
    %c0_7 = arith.constant 0 : index
    %10 = vector.load %arg5[%c0_6, %c0_7] : memref<32x32xbf16, #tpu.memory_space<vmem>>, vector<32x32xbf16>
    %cst_8 = arith.constant dense<0.000000e+00> : vector<8x32xf32>
    %11 = tpu.matmul %9, %10, %cst_8 {dimension_numbers = #tpu.dot_dimension_numbers<[1], [0], [0], [1], [0, 0, 1, 1], [], []>} : vector<8x32xbf16>, vector<32x32xbf16>, vector<8x32xf32> -> vector<8x32xf32>
    %c0_9 = arith.constant 0 : index
    %c0_10 = arith.constant 0 : index
    %12 = vector.load %arg6[%c0_9, %c0_10] : memref<1x32xf32, #tpu.memory_space<vmem>>, vector<1x32xf32>
    %13 = vector.broadcast %12 : vector<1x32xf32> to vector<8x32xf32>
    %14 = arith.addf %11, %13 : vector<8x32xf32>
    %cst_11 = arith.constant 0.000000e+00 : f32
    %15 = vector.broadcast %cst_11 : f32 to vector<8x32xf32>
    %16 = arith.maximumf %14, %15 : vector<8x32xf32>
    %17 = arith.truncf %16 : vector<8x32xf32> to vector<8x32xbf16>
    %c0_12 = arith.constant 0 : index
    %c0_13 = arith.constant 0 : index
    %18 = vector.load %arg7[%c0_12, %c0_13] : memref<32x128xbf16, #tpu.memory_space<vmem>>, vector<32x128xbf16>
    %cst_14 = arith.constant dense<0.000000e+00> : vector<8x128xf32>
    %19 = tpu.matmul %17, %18, %cst_14 {dimension_numbers = #tpu.dot_dimension_numbers<[1], [0], [0], [1], [0, 0, 1, 1], [], []>} : vector<8x32xbf16>, vector<32x128xbf16>, vector<8x128xf32> -> vector<8x128xf32>
    %c0_15 = arith.constant 0 : index
    %c0_16 = arith.constant 0 : index
    %20 = vector.load %arg8[%c0_15, %c0_16] : memref<1x128xf32, #tpu.memory_space<vmem>>, vector<1x128xf32>
    %21 = vector.broadcast %20 : vector<1x128xf32> to vector<8x128xf32>
    %22 = arith.addf %19, %21 : vector<8x128xf32>
    %23 = vector.extract_strided_slice %22 {offsets = [0, 0], sizes = [8, 8], strides = [1, 1]} : vector<8x128xf32> to vector<8x8xf32>
    %24 = vector.extract_strided_slice %22 {offsets = [0, 8], sizes = [8, 8], strides = [1, 1]} : vector<8x128xf32> to vector<8x8xf32>
    %cst_17 = arith.constant -2.000000e+01 : f32
    %cst_18 = arith.constant 2.000000e+00 : f32
    %25 = vector.broadcast %cst_17 : f32 to vector<8x8xf32>
    %26 = arith.maximumf %25, %24 : vector<8x8xf32>
    %27 = vector.broadcast %cst_18 : f32 to vector<8x8xf32>
    %28 = arith.minimumf %27, %26 : vector<8x8xf32>
    %29 = math.exp %28 : vector<8x8xf32>
    %c0_19 = arith.constant 0 : index
    %c0_20 = arith.constant 0 : index
    %30 = vector.load %arg2[%c0_19, %c0_20] : memref<8x8xf32, #tpu.memory_space<vmem>>, vector<8x8xf32>
    %31 = arith.mulf %29, %30 : vector<8x8xf32>
    %32 = arith.addf %23, %31 : vector<8x8xf32>
    %33 = math.tanh %32 : vector<8x8xf32>
    %34 = arith.mulf %30, %30 : vector<8x8xf32>
    %cst_21 = arith.constant -5.000000e-01 : f32
    %35 = vector.broadcast %cst_21 : f32 to vector<8x8xf32>
    %36 = arith.mulf %35, %34 : vector<8x8xf32>
    %37 = arith.subf %36, %28 : vector<8x8xf32>
    %cst_22 = arith.constant 0.918938517 : f32
    %38 = vector.broadcast %cst_22 : f32 to vector<8x8xf32>
    %39 = arith.subf %37, %38 : vector<8x8xf32>
    %40 = arith.mulf %33, %33 : vector<8x8xf32>
    %cst_23 = arith.constant 1.000000e+00 : f32
    %41 = vector.broadcast %cst_23 : f32 to vector<8x8xf32>
    %42 = arith.subf %41, %40 : vector<8x8xf32>
    %cst_24 = arith.constant 9.99999997E-7 : f32
    %43 = vector.broadcast %cst_24 : f32 to vector<8x8xf32>
    %44 = arith.addf %42, %43 : vector<8x8xf32>
    %45 = math.log %44 : vector<8x8xf32>
    %46 = arith.subf %39, %45 : vector<8x8xf32>
    %cst_25 = arith.constant dense<0.000000e+00> : vector<8xf32>
    %47 = vector.multi_reduction <add>, %46, %cst_25 [1] : vector<8x8xf32> to vector<8xf32>
    %48 = vector.shape_cast %47 : vector<8xf32> to vector<8x1xf32>
    %cst_26 = arith.constant 0.000000e+00 : f32
    %49 = vector.broadcast %cst_26 : f32 to vector<8x128xf32>
    %c0_27 = arith.constant 0 : index
    %c0_28 = arith.constant 0 : index
    %50 = vector.load %arg9[%c0_27, %c0_28] : memref<8x128xf32, #tpu.memory_space<vmem>>, vector<8x128xf32>
    tpu.vector_store %arg9[%c0_27, %c0_28], %49 {strides = array<i32>} : memref<8x128xf32, #tpu.memory_space<vmem>>, vector<8x128xf32>,
    %c0_29 = arith.constant 0 : index
    %c0_30 = arith.constant 0 : index
    %51 = vector.load %arg9[%c0_29, %c0_30] : memref<8x128xf32, #tpu.memory_space<vmem>>, vector<8x8xf32>
    tpu.vector_store %arg9[%c0_29, %c0_30], %33 {strides = array<i32>} : memref<8x128xf32, #tpu.memory_space<vmem>>, vector<8x8xf32>,
    %c0_31 = arith.constant 0 : index
    %c8 = arith.constant 8 : index
    %52 = vector.load %arg9[%c0_31, %c8] : memref<8x128xf32, #tpu.memory_space<vmem>>, vector<8x8xf32>
    tpu.vector_store %arg9[%c0_31, %c8], %23 {strides = array<i32>} : memref<8x128xf32, #tpu.memory_space<vmem>>, vector<8x8xf32>,
    %c0_32 = arith.constant 0 : index
    %c16 = arith.constant 16 : index
    %53 = vector.load %arg9[%c0_32, %c16] : memref<8x128xf32, #tpu.memory_space<vmem>>, vector<8x8xf32>
    tpu.vector_store %arg9[%c0_32, %c16], %28 {strides = array<i32>} : memref<8x128xf32, #tpu.memory_space<vmem>>, vector<8x8xf32>,
    %c0_33 = arith.constant 0 : index
    %c24 = arith.constant 24 : index
    %54 = vector.load %arg9[%c0_33, %c24] : memref<8x128xf32, #tpu.memory_space<vmem>>, vector<8x8xf32>
    tpu.vector_store %arg9[%c0_33, %c24], %29 {strides = array<i32>} : memref<8x128xf32, #tpu.memory_space<vmem>>, vector<8x8xf32>,
    %c0_34 = arith.constant 0 : index
    %c32 = arith.constant 32 : index
    %55 = vector.load %arg9[%c0_34, %c32] : memref<8x128xf32, #tpu.memory_space<vmem>>, vector<8x8xf32>
    tpu.vector_store %arg9[%c0_34, %c32], %32 {strides = array<i32>} : memref<8x128xf32, #tpu.memory_space<vmem>>, vector<8x8xf32>,
    %c0_35 = arith.constant 0 : index
    %c40 = arith.constant 40 : index
    %56 = vector.load %arg9[%c0_35, %c40] : memref<8x128xf32, #tpu.memory_space<vmem>>, vector<8x1xf32>
    tpu.vector_store %arg9[%c0_35, %c40], %48 {strides = array<i32>} : memref<8x128xf32, #tpu.memory_space<vmem>>, vector<8x1xf32>,
    return
  }
  func.func @transform_0(%arg0: i32) -> (i32, i32) {
    %c0_i32 = arith.constant 0 : i32
    %c0_i32_0 = arith.constant 0 : i32
    return %arg0, %c0_i32 : i32, i32
  }
  func.func @transform_1(%arg0: i32) -> (i32, i32) {
    %c0_i32 = arith.constant 0 : i32
    %c0_i32_0 = arith.constant 0 : i32
    return %arg0, %c0_i32 : i32, i32
  }
  func.func @transform_2(%arg0: i32) -> (i32, i32) {
    %c0_i32 = arith.constant 0 : i32
    %c0_i32_0 = arith.constant 0 : i32
    %c0_i32_1 = arith.constant 0 : i32
    return %c0_i32, %c0_i32_0 : i32, i32
  }
  func.func @transform_3(%arg0: i32) -> (i32, i32) {
    %c0_i32 = arith.constant 0 : i32
    %c0_i32_0 = arith.constant 0 : i32
    %c0_i32_1 = arith.constant 0 : i32
    return %c0_i32, %c0_i32_0 : i32, i32
  }
  func.func @transform_4(%arg0: i32) -> (i32, i32) {
    %c0_i32 = arith.constant 0 : i32
    %c0_i32_0 = arith.constant 0 : i32
    %c0_i32_1 = arith.constant 0 : i32
    return %c0_i32, %c0_i32_0 : i32, i32
  }
  func.func @transform_5(%arg0: i32) -> (i32, i32) {
    %c0_i32 = arith.constant 0 : i32
    %c0_i32_0 = arith.constant 0 : i32
    %c0_i32_1 = arith.constant 0 : i32
    return %c0_i32, %c0_i32_0 : i32, i32
  }
  func.func @transform_6(%arg0: i32) -> (i32, i32) {
    %c0_i32 = arith.constant 0 : i32
    %c0_i32_0 = arith.constant 0 : i32
    %c0_i32_1 = arith.constant 0 : i32
    return %c0_i32, %c0_i32_0 : i32, i32
  }
  func.func @transform_7(%arg0: i32) -> (i32, i32) {
    %c0_i32 = arith.constant 0 : i32
    %c0_i32_0 = arith.constant 0 : i32
    %c0_i32_1 = arith.constant 0 : i32
    return %c0_i32, %c0_i32_0 : i32, i32
  }
  func.func @transform_8(%arg0: i32) -> (i32, i32) {
    %c0_i32 = arith.constant 0 : i32
    %c0_i32_0 = arith.constant 0 : i32
    return %arg0, %c0_i32 : i32, i32
  }
}

</mosaic_0001>

<bundles_post_ra>
// kernel: tpu_custom_call.1
= control target key start
LH: loop header
LB: loop body
LE: loop exit
PB: predicated region body
PF: predicated region fallthrough
CT: control target
= control target key end

     0   :  { %13 = vsyncpa [#allocation3], 0  ;;  %s692_s0 = inlined_call_operand.hbm [shape: f32[8,32], index: 0, kind: input, shape index: {}]   ;;  %s693_s1 = inlined_call_operand.hbm [shape: f32[8,8], index: 1, kind: input, shape index: {}]   ;;  %s694_s2 = inlined_call_operand.hbm [shape: bf16[32,32], index: 2, kind: input, shape index: {}]   ;;  %s695_s3 = inlined_call_operand.vmem [shape: f32[1,32], index: 3, kind: input, shape index: {}]   ;;  %s696_s4 = inlined_call_operand.hbm [shape: bf16[32,32], index: 4, kind: input, shape index: {}]   ;;  %s697_s5 = inlined_call_operand.vmem [shape: f32[1,32], index: 5, kind: input, shape index: {}]   ;;  %s698_s6 = inlined_call_operand.vmem [shape: bf16[32,128], index: 6, kind: input, shape index: {}]   ;;  %s699_s7 = inlined_call_operand.vmem [shape: f32[1,128], index: 7, kind: input, shape index: {}]   ;;  %s700_s8 = inlined_call_operand.hbm [shape: f32[8,128], index: 8, kind: output, shape index: {}]  }
   0x1   :  { %14 = vsyncpa [#allocation6], 0 }
   0x2   :  { %15 = vsyncpa [#allocation9], 0 }
   0x3   :  { %16 = vsyncpa [#allocation4], 0  ;;  %s554_s27 = smov [#allocation5]   ;;  %s555_s29 = smov [#allocation2]  }
   0x4   :  { %s33_s28 = sshll.u32 %s554_s27, 4  ;;  %s23_s30 = sshll.u32 %s555_s29, 4  ;;  %s34_s28 = int_to_ptr.vmem [resolvable:$true] %s33_s28  ;;  %s24_s30 = int_to_ptr.vmem [resolvable:$true] %s23_s30 }
   0x5   :  { %s436_s11 = scalar_lea.hbm %s693_s1, 128 }
   0x6   :  { %p437_p0 = scmp.ne.s32.totalorder %s693_s1, %s436_s11  ;;  %p440_p1 = scmp.lt.u32.totalorder %s436_s11, %s693_s1 }
   0x8   :  { %p442_p2 = pnand %p440_p1, %p437_p0 }
   0xa   :  { %445 = shalt.err (!%p442_p2)
}
   0xb   :  { %s446_s16 = scalar_lea.vmem %s34_s28, 128  ;;  %p451_p4 = scmp.lt.s32.totalorder %s34_s28, %s34_s28 }
   0xc   :  { %p447_p3 = scmp.ne.s32.totalorder %s34_s28, %s446_s16  ;;  %p452_p5 = scmp.lt.s32.totalorder %s446_s16, %s446_s16 }
   0xe   :  { %p453_p6 = por %p452_p5, %p451_p4 }
  0x10   :  { %p454_p7 = pnand %p453_p6, %p447_p3 }
  0x12   :  { %457 = shalt.err (!%p454_p7)
}
  0x13   :  { %36 = dma.hbm_to_vmem [thread:$0]  %s693_s1, 128, %s34_s28, [#allocation6]  }
  0x14   :  { %s458_s21 = scalar_lea.hbm %s692_s0, 128 }
  0x15   :  { %p459_p8 = scmp.ne.s32.totalorder %s692_s0, %s458_s21  ;;  %p462_p9 = scmp.lt.u32.totalorder %s458_s21, %s692_s0 }
  0x17   :  { %p464_p10 = pnand %p462_p9, %p459_p8 }
  0x19   :  { %467 = shalt.err (!%p464_p10)
}
  0x1a   :  { %s468_s26 = scalar_lea.vmem %s24_s30, 128  ;;  %p473_p12 = scmp.lt.s32.totalorder %s24_s30, %s24_s30 }
  0x1b   :  { %p469_p11 = scmp.ne.s32.totalorder %s24_s30, %s468_s26  ;;  %p474_p13 = scmp.lt.s32.totalorder %s468_s26, %s468_s26 }
  0x1d   :  { %p475_p0 = por %p474_p13, %p473_p12 }
  0x1f   :  { %p476_p1 = pnand %p475_p0, %p469_p11 }
  0x21   :  { %479 = shalt.err (!%p476_p1)
}
  0x22   :  { %26 = dma.hbm_to_vmem [thread:$0]  %s692_s0, 128, %s24_s30, [#allocation3]  }
  0x23   :  { %s556_s28 = smov [#allocation7]   ;;  %s480_s11 = scalar_lea.hbm %s694_s2, 256 }
  0x24   :  { %s42_s29 = sshll.u32 %s556_s28, 4  ;;  %p481_p2 = scmp.ne.s32.totalorder %s694_s2, %s480_s11  ;;  %s43_s29 = int_to_ptr.vmem [resolvable:$true] %s42_s29 }
  0x25   :  { %p484_p3 = scmp.lt.u32.totalorder %s480_s11, %s694_s2 }
  0x27   :  { %p486_p4 = pnand %p484_p3, %p481_p2 }
  0x29   :  { %489 = shalt.err (!%p486_p4)
}
  0x2a   :  { %s490_s16 = scalar_lea.vmem %s43_s29, 256  ;;  %p495_p6 = scmp.lt.s32.totalorder %s43_s29, %s43_s29 }
  0x2b   :  { %p491_p5 = scmp.ne.s32.totalorder %s43_s29, %s490_s16  ;;  %p496_p7 = scmp.lt.s32.totalorder %s490_s16, %s490_s16 }
  0x2d   :  { %p497_p8 = por %p496_p7, %p495_p6 }
  0x2f   :  { %p498_p9 = pnand %p497_p8, %p491_p5 }
  0x31   :  { %501 = shalt.err (!%p498_p9)
}
  0x32   :  { %s557_s0 = smov 64   ;;  %s558_s30 = smov 4  }
  0x33   :  { %48 = dma.hbm_to_vmem [thread:$0]  %s694_s2, 256, %s43_s29, [#allocation6], %s557_s0, %s557_s0, %s558_s30  }
  0x34   :  { %s559_s19 = smov [#allocation8]   ;;  %s502_s23 = scalar_lea.hbm %s696_s4, 256 }
  0x35   :  { %s56_s20 = sshll.u32 %s559_s19, 4  ;;  %p503_p10 = scmp.ne.s32.totalorder %s696_s4, %s502_s23  ;;  %s57_s20 = int_to_ptr.vmem [resolvable:$true] %s56_s20 }
  0x36   :  { %p506_p11 = scmp.lt.u32.totalorder %s502_s23, %s696_s4 }
  0x38   :  { %p508_p12 = pnand %p506_p11, %p503_p10 }
  0x3a   :  { %511 = shalt.err (!%p508_p12)
}
  0x3b   :  { %s512_s27 = scalar_lea.vmem %s57_s20, 256  ;;  %p517_p0 = scmp.lt.s32.totalorder %s57_s20, %s57_s20 }
  0x3c   :  { %p513_p13 = scmp.ne.s32.totalorder %s57_s20, %s512_s27  ;;  %p518_p1 = scmp.lt.s32.totalorder %s512_s27, %s512_s27 }
  0x3e   :  { %p519_p2 = por %p518_p1, %p517_p0 }
  0x40   :  { %p520_p3 = pnand %p519_p2, %p513_p13 }
  0x42   :  { %523 = shalt.err (!%p520_p3)
}
  0x43   :  { %62 = dma.hbm_to_vmem [thread:$0]  %s696_s4, 256, %s57_s20, [#allocation9], %s557_s0, %s557_s0, %s558_s30  }
  0x44   :  { %546 = dma.done.wait [#allocation3], 128  }
  0x45   :  { %547 = vsyncadd [#allocation3], 4294967168 }
  0x46   :  { %548 = dma.done.wait [#allocation6], 384  }
  0x47   :  { %549 = vsyncadd [#allocation6], 4294966912 }
  0x48   :  { %550 = dma.done.wait [#allocation9], 256  }
  0x49   :  { %551 = vsyncadd [#allocation9], 4294967040  ;;  %v560_v0 = vmov 0.0   ;;  %vm561_vm0 = vmmov 0   ;;  %v424_v1 = vld [vmem:[#allocation7] sm:$0xff]   ;;  %v425_v2 = vld [vmem:[#allocation7 + $0x8] sm:$0xff]  }
  0x4a   :  { %387 = vmatprep.subr.bf16.mxu0 %v560_v0  ;;  %321 = vst [vmem:[#allocation10] sm:$0xff] %v560_v0  ;;  %391 = vmatprep.mubr.msk.bf16.mxu0 %vm561_vm0, %v560_v0  ;;  %v82_v3 = vld [vmem:[#allocation2] sm:$0xff]  ;;  %vm107_vm1 = vcmask 261120   ;;  %v427_v6 = vld [vmem:[#allocation8 + $0x8] sm:$0xff]   ;;  %v428_v7 = vld [vmem:[%s698_s6] sm:$0xff]   ;;  %s562_s13 = smov 8  }
  0x4b   :  { %395 = vmatprep.subr.bf16.mxu1 %v560_v0  ;;  %399 = vmatprep.mubr.msk.bf16.mxu1 %vm561_vm0, %v560_v0  ;;  %v83_v4 = vpack.c.bf16 %v82_v3, %v82_v3  ;;  %v426_v5 = vld [vmem:[#allocation8] sm:$0xff]   ;;  %v365_v8 = vld [vmem:[%s695_s3] ss:$0 sm:$0xff]  ;;  %v429_v16 = vld [vmem:[%s698_s6 + $0x8] sm:$0xff]   ;;  %s564_s6 = smov 16   ;;  %vm317_vm2 = vcmask 64512  }
  0x4c   :  { %388 = vmatpush3.bf16.msra.mxu0 %v424_v1  ;;  %396 = vmatpush3.bf16.msra.mxu1 %v426_v5  ;;  %v291_v17 = vld [vmem:[#allocation5] sm:$0xff]  ;;  %v369_v18 = vld [vmem:[%s697_s5] ss:$0 sm:$0xff]  ;;  %s563_s5 = smov 120   ;;  %vm327_vm3 = vcmask 130112   ;;  %vm332_vm4 = vcmask 195712  }
  0x4d   :  { %389 = vmatprep.subr.bf16.mxu0 %v560_v0  ;;  %397 = vmatprep.subr.bf16.mxu1 %v560_v0  ;;  %v373_v26 = vld [vmem:[%s699_s7] ss:$0 sm:$0xff]  ;;  %s565_s7 = smov 32   ;;  %vm338_vm5 = vcmask 261312   ;;  %v303_v47 = vmul.f32 %v291_v17, %v291_v17  ;;  %vm344_vm6 = vcmask 326912   ;;  %s566_s0 = smov [#allocation10]  }
  0x4e   :  { %293 = vrot.lane.b32.xlu0 %v291_v17, %s562_s13  ;;  %s354_s30 = sshll.u32 %s566_s0, 4  ;;  %vm346_vm7 = vcmask 335168   ;;  %s355_s30 = int_to_ptr.vmem [resolvable:$true] %s354_s30 }
  0x4f   :  { %v304_v48 = vmul.f32 -0.5, %v303_v47  ;;  %s524_s17 = scalar_lea.vmem %s355_s30, 128  ;;  %p529_p5 = scmp.lt.s32.totalorder %s355_s30, %s355_s30 }
  0x50   :  { %390 = vmatpush3.bf16.msra.mxu0 %v425_v2  ;;  %398 = vmatpush3.bf16.msra.mxu1 %v427_v6  ;;  %p525_p4 = scmp.ne.s32.totalorder %s355_s30, %s524_s17  ;;  %p530_p6 = scmp.lt.s32.totalorder %s524_s17, %s524_s17 }
  0x51   :  { %403 = vmatprep.subr.bf16.mxu0 %v560_v0 }
  0x52   :  { %p531_p7 = por %p530_p6, %p529_p5 }
  0x53   :  { %392 = vmatmul.mubr.msk.bf16.vlgmr.msra.gmra.mrb[0].mxu0 %vm107_vm1, %v83_v4 }
  0x54   :  { %407 = vmatprep.mubr.msk.bf16.mxu0 %vm561_vm0, %v560_v0  ;;  %404 = vmatpush3.bf16.msra.mxu0 %v428_v7  ;;  %p532_p8 = pnand %p531_p7, %p525_p4 }
  0x55   :  { %405 = vmatprep.subr.bf16.mxu0 %v560_v0 }
  0x58   :  { %406 = vmatpush3.bf16.msra.mxu0 %v429_v16 }
  0xc0   :  { %v294_v35 = vpop.permute.xlu0 %293 }
 0x126   :  { %v145_v9 = vpop.f32.mrb[0].mxu0 }
 0x127   :  { %v146_v10 = vadd.f32 %v365_v8, %v145_v9  ;;  %v393_v11 = vpop.f32.mrb[1].mxu0 }
 0x128   :  { %v148_v12 = vpop.f32.mrb[2].mxu0 }
 0x129   :  { %v151_v13 = vmax.f32 %v146_v10, 0.0  ;;  %v394_v14 = vpop.f32.mrb[3].mxu0 }
 0x12b   :  { %v152_v15 = vpack.c.bf16 %v151_v13, %v151_v13 }
 0x12d   :  { %400 = vmatmul.mubr.msk.bf16.vlgmr.msra.gmra.mrb[0].mxu1 %vm107_vm1, %v152_v15 }
 0x200   :  { %v213_v19 = vpop.f32.mrb[0].mxu1 }
 0x201   :  { %v214_v20 = vadd.f32 %v369_v18, %v213_v19  ;;  %v401_v21 = vpop.f32.mrb[1].mxu1 }
 0x202   :  { %v216_v22 = vpop.f32.mrb[2].mxu1 }
 0x203   :  { %v219_v23 = vmax.f32 %v214_v20, 0.0  ;;  %v402_v24 = vpop.f32.mrb[3].mxu1 }
 0x205   :  { %v220_v25 = vpack.c.bf16 %v219_v23, %v219_v23 }
 0x207   :  { %408 = vmatmul.mubr.msk.bf16.vlgmr.msra.gmra.mrb[4].mxu0 %vm107_vm1, %v220_v25 }
 0x2da   :  { %v281_v27 = vpop.f32.mrb[4].mxu0 }
 0x2db   :  { %v282_v28 = vadd.f32 %v373_v26, %v281_v27  ;;  %v409_v29 = vpop.f32.mrb[5].mxu0 }
 0x2dc   :  { %v284_v30 = vpop.f32.mrb[6].mxu0 }
 0x2dd   :  { %v410_v31 = vpop.f32.mrb[7].mxu0  ;;  %v287_v32 = vmax.f32 %v282_v28, -20.0 }
 0x2df   :  { %v288_v33 = vmin.f32 %v287_v32, 2.0 }
 0x2e1   :  { %306 = vrot.lane.b32.xlu1 %v288_v33, %s563_s5  ;;  %v289_v34 = vmul.f32 1.442695, %v288_v33 }
 0x2e3   :  { %430 = vpow2.f32 %v289_v34 }
 0x2ed   :  { %v431_v36 = vpop.eup %430 }
 0x2ee   :  { %v296_v37 = vmul.f32 %v431_v36, %v294_v35 }
 0x2f0   :  { %298 = vrot.lane.b32.xlu0 %v296_v37, %s563_s5 }
 0x2f4   :  { %324 = vrot.lane.b32.xlu0 %v282_v28, %s562_s13 }
 0x2f8   :  { %329 = vrot.lane.b32.xlu0 %v288_v33, %s562_s13 }
 0x2fc   :  { %335 = vrot.lane.b32.xlu0 %v431_v36, %s564_s6 }
 0x353   :  { %v307_v49 = vpop.permute.xlu1 %306 }
 0x354   :  { %v309_v50 = vsub.f32 %v304_v48, %v307_v49 }
 0x356   :  { %v377_v52 = vadd.f32 -0.9189385, %v309_v50 }
 0x362   :  { %v299_v38 = vpop.permute.xlu0 %298 }
 0x363   :  { %v301_v39 = vadd.f32 %v299_v38, %v282_v28 }
 0x365   :  { %432 = vtanh.f32 %v301_v39  ;;  %341 = vrot.lane.b32.xlu0 %v301_v39, %s565_s7 }
 0x366   :  { %v325_v40 = vpop.permute.xlu0 %324 }
 0x36a   :  { %v330_v41 = vpop.permute.xlu0 %329 }
 0x36e   :  { %v336_v44 = vpop.permute.xlu0 %335 }
 0x36f   :  { %v433_v42 = vpop.eup %432 }
 0x370   :  { %v311_v43 = vmul.f32 %v433_v42, %v433_v42  ;;  %322 = vst.msk [vmem:[#allocation10] sm:$0xff] %vm317_vm2, %v433_v42 }
 0x371   :  { %328 = vst.msk [vmem:[#allocation10] sm:$0xff] %vm327_vm3, %v325_v40 }
 0x372   :  { %v312_v45 = vsub.f32 1.0, %v311_v43  ;;  %333 = vst.msk [vmem:[#allocation10] sm:$0xff] %vm332_vm4, %v330_v41 }
 0x373   :  { %339 = vst.msk [vmem:[#allocation10] sm:$0xff] %vm338_vm5, %v336_v44 }
 0x374   :  { %v313_v46 = vadd.f32 1e-06, %v312_v45 }
 0x376   :  { %434 = vlog2.f32 %v313_v46 }
 0x380   :  { %v435_v51 = vpop.eup %434 }
 0x381   :  { %v315_v53 = vmul.f32 0.6931472, %v435_v51 }
 0x383   :  { %v316_v54 = vsub.f32 %v377_v52, %v315_v53 }
 0x385   :  { %v318_v55 = vsel %vm317_vm2, %v316_v54, 0.0 }
 0x386   :  { %319 = vadd.xlane.f32.xlu1 %v318_v55 }
 0x3d7   :  { %v342_v56 = vpop.permute.xlu0 %341 }
 0x3d8   :  { %345 = vst.msk [vmem:[#allocation10] sm:$0xff] %vm344_vm6, %v342_v56 }
 0x413   :  { %v320_v57 = vpop.xlane.xlu1 %319 }
 0x414   :  { %347 = vst.msk [vmem:[#allocation10] sm:$0xff] %vm346_vm7, %v320_v57 }
 0x415   :  { %535 = shalt.err (!%p532_p8)
}
 0x416   :  { %s536_s20 = scalar_lea.hbm %s700_s8, 128 }
 0x417   :  { %p537_p9 = scmp.ne.s32.totalorder %s700_s8, %s536_s20  ;;  %p540_p10 = scmp.lt.u32.totalorder %s536_s20, %s700_s8 }
 0x419   :  { %p542_p11 = pnand %p540_p10, %p537_p9 }
 0x41b   :  { %545 = shalt.err (!%p542_p11)
}
 0x41c   :  { %357 = dma.vmem_to_hbm [thread:$0]  %s355_s30, 128, %s700_s8, [#allocation4]  }
 0x41d   :  { %552 = dma.done.wait [#allocation4], 128  }
 0x41e   :  { %553 = vsyncadd [#allocation4], 4294967168 }
 0x41f   :  { %361 = vsyncpa [#allocation3], 1 }
 0x420   :  { %362 = vsyncpa [#allocation6], 1 }
 0x421   :  { %363 = vsyncpa [#allocation9], 1 }
 0x422   :  { %364 = vsyncpa [#allocation4], 1 }

</bundles_post_ra>
